<compile_context>
chip_gen: v5e
topology: v5e:2x2
jax: 0.10.0
libtpu: 0.0.40
codegen_flags: <defaults>
</compile_context>

<pallas_src>
import jax
import jax.numpy as jnp
from jax.experimental import pallas as pl
from jax.experimental.pallas import tpu as pltpu

_MIB = 1024 * 1024


def _gray_kernel(img_ref, out_ref):
    # img_ref: (3, tile_m, tile_n) VMEM tile;  out_ref: (tile_m, tile_n).
    # bf16 stays bf16 (PyTorch weak-scalar promotion; cheaper on v6e/v7x);
    # integer and f32 inputs are computed in f32.
    acc_dt = jnp.bfloat16 if img_ref.dtype == jnp.bfloat16 else jnp.float32
    r = img_ref[0].astype(acc_dt)
    g = img_ref[1].astype(acc_dt)
    b = img_ref[2].astype(acc_dt)
    gray = 0.2989 * r + 0.587 * g + 0.114 * b
    if jnp.issubdtype(out_ref.dtype, jnp.integer):
        info = jnp.iinfo(out_ref.dtype)
        gray = jnp.clip(jnp.round(gray.astype(jnp.float32)), info.min, info.max)
    out_ref[...] = gray.astype(out_ref.dtype)


def _round_down(x, m):
    return (x // m) * m


def _physical_vmem_bytes() -> int:
    """Physical VMEM of the attached chip; conservative fallback = 64 MiB
    (v7x per-TensorCore) if the query is unavailable."""
    try:
        cap = int(pltpu.get_tpu_info().vmem_capacity_bytes)
        if cap > 0:
            return cap
    except Exception:
        pass
    return 64 * _MIB


def _dense_spatial_view(H, W):
    """Return (M, N) with M*N == H*W: a lane-dense (N % 128 == 0 when
    possible) and sublane-dense (M % 8 == 0 when possible) 2D view of the
    spatial dims.  A reshape of contiguous CHW data -> layout plumbing only.
    """
    if W >= 128:
        return H, W                       # rows already lane-dense
    S = H * W
    if S % 128 != 0:
        return 1, S                       # tiny / odd sizes: single flat row
    best_mn, best_score = None, None
    k = 1
    while 128 * k <= S and k <= 4096:
        n = 128 * k
        if S % n == 0:
            m = S // n
            # Prefer sublane-dense rows, then enough rows to split the grid
            # (>= 8 tiles of 8 rows), then wider (but bounded) rows.
            score = (m % 8 == 0, m >= 64, min(n, 2048), n)
            if best_score is None or score > best_score:
                best_mn, best_score = (m, n), score
        k += 1
    return best_mn if best_mn is not None else (1, S)


def _pick_tiles(M, N, bytes_per_px, budget, *, align=8, target_steps=8,
                min_tile_bytes=2 * _MIB):
    """Choose (tile_m, tile_n).

    Full-width rows (tile_n == N) whenever an `align`-row slab fits: a
    full-width row-block of a contiguous view is one contiguous per-channel
    DMA.  The leading (M) axis is then split so that the grid has
    ~target_steps steps for large images (pipelining + both v7x TensorCores
    get work), each step's double-buffered working set stays >= min_tile_bytes
    (HBM-roofline plateau), and the working set never exceeds `budget`.
    Only genuinely huge rows fall back to splitting N as well.
    """
    row_bytes = bytes_per_px * N
    if align * row_bytes <= budget:
        tile_n = N
        cap = _round_down(budget // row_bytes, align)                 # VMEM
        want = max(align, _round_down(pl.cdiv(M, target_steps), align))   # steps
        floor = max(align, _round_down(min_tile_bytes // row_bytes, align))  # plateau
        tile_m = min(cap, max(want, floor))
        if tile_m >= M:
            tile_m = M                                                # full extent
    else:
        # Rows so large that even an align-row slab blows the budget: split N
        # too, keeping the tile as large as the budget allows (multi-MiB steps
        # rather than many tiny strided DMAs).
        tile_m = M if M <= align else align
        tile_n = max(128, _round_down(budget // (bytes_per_px * max(tile_m, 8)), 128))
        if tile_n >= N:
            tile_n = N
    return int(tile_m), int(tile_n)


def to_grayscale(img: jax.Array, *, out_dtype=None,
                 vmem_budget_bytes: int = 16 * _MIB) -> jax.Array:
    """img: (C, H, W) with C >= 3. Returns (H, W) grayscale.

    out_dtype=None reproduces the PyTorch module's promotion (float inputs
    keep their dtype, integer inputs promote to float32).  Passing an integer
    out_dtype (e.g. jnp.uint8) rounds/clips and writes that dtype instead
    (torchvision-style), cutting output HBM traffic 4x for uint8 images.
    """
    assert img.ndim == 3 and img.shape[0] >= 3, "expected CHW input with >=3 channels"
    C, H, W = img.shape
    if out_dtype is None:
        out_dtype = img.dtype if jnp.issubdtype(img.dtype, jnp.floating) else jnp.float32
    out_dtype = jnp.dtype(out_dtype)

    # Sublane+lane dense spatial view (no 8x sublane padding of a (1,H*W) row).
    M, N = _dense_spatial_view(H, W)
    x = img if (M, N) == (H, W) else img.reshape(C, M, N)

    # VMEM budget / limit tied to the detected chip (v7x has only 64 MiB/TC;
    # v5e/v6e have 128 MiB).  The budget already counts double buffers.
    phys = _physical_vmem_bytes()
    budget = int(min(vmem_budget_bytes, phys // 2))
    vmem_limit = int(min(max(budget + budget // 2, 32 * _MIB), (phys * 3) // 4))

    in_isz = jnp.dtype(img.dtype).itemsize
    out_isz = out_dtype.itemsize
    bytes_per_px = 2 * (3 * in_isz + out_isz)        # double-buffered in + out
    # Sub-32-bit dtypes pack along sublanes: keep tile_m aligned to the packed
    # sublane group (8 for 32-bit, 16 for bf16, 32 for u8).
    sublane_align = 8 * max(1, 4 // min(in_isz, out_isz))
    tile_m, tile_n = _pick_tiles(M, N, bytes_per_px, budget, align=sublane_align)

    grid = (pl.cdiv(M, tile_m), pl.cdiv(N, tile_n))

    out = pl.pallas_call(
        _gray_kernel,
        out_shape=jax.ShapeDtypeStruct((M, N), out_dtype),
        grid=grid,
        # Channel block of 3 at block-index 0: the index_map always returns 0
        # on the channel axis, so only the RGB planes are ever DMA'd even when
        # C > 3, and the trailing partial channel block is never touched.
        # (If you ever change this index_map, keep the channel index at 0.)
        in_specs=[pl.BlockSpec((3, tile_m, tile_n), lambda i, j: (0, i, j))],
        out_specs=pl.BlockSpec((tile_m, tile_n), lambda i, j: (i, j)),
        compiler_params=pltpu.CompilerParams(
            # Independent tiles on both axes; the leading (M) axis carries the
            # multi-way split so v7x can shard it across both TensorCores.
            # (If "parallel" does not shard across TCs on v7x, switch the
            # leading axis to pltpu.CORE_PARALLEL.)
            dimension_semantics=("parallel", "parallel"),
            vmem_limit_bytes=vmem_limit,
        ),
    )(x)
    return out.reshape(H, W)


if __name__ == "__main__":
    key = jax.random.PRNGKey(0)

    def ref_gray(a):
        a = a.astype(jnp.float32)
        return 0.2989 * a[0] + 0.587 * a[1] + 0.114 * a[2]

    # 1) Small CHW image (W < 128 -> dense reshaped spatial view).
    img = jax.random.uniform(key, (3, 16, 16), dtype=jnp.float32)
    gray = jax.block_until_ready(to_grayscale(img))
    assert gray.shape == (16, 16) and gray.dtype == jnp.float32
    assert jnp.allclose(gray, ref_gray(img), atol=1e-5), "mismatch vs reference (3ch)"

    # 2) C > 3: extra channels ignored purely via the BlockSpec (no img[:3] copy).
    img4 = jax.random.uniform(jax.random.PRNGKey(0), (4, 16, 16), dtype=jnp.float32)
    gray4 = jax.block_until_ready(to_grayscale(img4))
    assert gray4.shape == (16, 16)
    assert jnp.allclose(gray4, ref_gray(img4), atol=1e-5), "mismatch vs reference (4ch)"

    # 3) Wider image with a small VMEM budget -> forced multi-step pipelined
    #    grid along the leading axis (grid = (4, 1) here).
    img_w = jax.random.uniform(jax.random.PRNGKey(0), (3, 64, 256), dtype=jnp.float32)
    gray_w = jax.block_until_ready(to_grayscale(img_w, vmem_budget_bytes=128 * 1024))
    assert gray_w.shape == (64, 256)
    assert jnp.allclose(gray_w, ref_gray(img_w), atol=1e-5), "mismatch vs reference (tiled)"

    # 4) uint8 input: default promotes to float32 (module semantics); optional
    #    out_dtype=uint8 rounds/clips and writes u8 (4x less output traffic).
    img_u8 = jax.random.randint(jax.random.PRNGKey(0), (3, 32, 32), 0, 256,
                                dtype=jnp.int32).astype(jnp.uint8)
    gray_f = jax.block_until_ready(to_grayscale(img_u8))
    assert gray_f.dtype == jnp.float32 and gray_f.shape == (32, 32)
    assert jnp.allclose(gray_f, ref_gray(img_u8), atol=1e-2), "mismatch vs reference (u8->f32)"
    gray_u8 = jax.block_until_ready(to_grayscale(img_u8, out_dtype=jnp.uint8))
    ref_u8 = jnp.clip(jnp.round(ref_gray(img_u8)), 0, 255).astype(jnp.uint8)
    assert gray_u8.dtype == jnp.uint8
    assert int(jnp.max(jnp.abs(gray_u8.astype(jnp.int32) - ref_u8.astype(jnp.int32)))) <= 1, \
        "mismatch vs reference (u8->u8)"

    # 5) bf16 input: computed and stored in bf16.
    img_bf = jax.random.uniform(jax.random.PRNGKey(0), (3, 40, 160),
                                dtype=jnp.float32).astype(jnp.bfloat16)
    gray_bf = jax.block_until_ready(to_grayscale(img_bf))
    assert gray_bf.dtype == jnp.bfloat16 and gray_bf.shape == (40, 160)
    assert jnp.allclose(gray_bf.astype(jnp.float32), ref_gray(img_bf), atol=2e-2), \
        "mismatch vs reference (bf16)"

    print("KERNEL_OK")
</pallas_src>

<mosaic_0001>
module attributes {stable_mosaic.version = 11 : i64} {
  func.func @_gray_kernel(%arg0: i32, %arg1: i32, %arg2: memref<3x1x256xf32, #tpu.memory_space<vmem>>, %arg3: memref<1x256xf32, #tpu.memory_space<vmem>>) attributes {dimension_semantics = [#tpu.dimension_semantics<parallel>, #tpu.dimension_semantics<parallel>], iteration_bounds = array<i64: 1, 1>, scalar_prefetch = 0 : i64, scratch_operands = 0 : i64, tpu.core_type = #tpu.core_type<tc>, window_params = [{transform_indices = @transform_0, window_bounds = array<i64: 3, 1, 256>}, {transform_indices = @transform_1, window_bounds = array<i64: 1, 256>}]} {
    %c0 = arith.constant 0 : index
    %c0_0 = arith.constant 0 : index
    %c0_1 = arith.constant 0 : index
    %0 = vector.load %arg2[%c0, %c0_0, %c0_1] : memref<3x1x256xf32, #tpu.memory_space<vmem>>, vector<1x1x256xf32>
    %1 = vector.shape_cast %0 : vector<1x1x256xf32> to vector<1x256xf32>
    %c1 = arith.constant 1 : index
    %c0_2 = arith.constant 0 : index
    %c0_3 = arith.constant 0 : index
    %2 = vector.load %arg2[%c1, %c0_2, %c0_3] : memref<3x1x256xf32, #tpu.memory_space<vmem>>, vector<1x1x256xf32>
    %3 = vector.shape_cast %2 : vector<1x1x256xf32> to vector<1x256xf32>
    %c2 = arith.constant 2 : index
    %c0_4 = arith.constant 0 : index
    %c0_5 = arith.constant 0 : index
    %4 = vector.load %arg2[%c2, %c0_4, %c0_5] : memref<3x1x256xf32, #tpu.memory_space<vmem>>, vector<1x1x256xf32>
    %5 = vector.shape_cast %4 : vector<1x1x256xf32> to vector<1x256xf32>
    %cst = arith.constant 2.989000e-01 : f32
    %6 = vector.broadcast %cst : f32 to vector<1x256xf32>
    %7 = arith.mulf %6, %1 : vector<1x256xf32>
    %cst_6 = arith.constant 5.870000e-01 : f32
    %8 = vector.broadcast %cst_6 : f32 to vector<1x256xf32>
    %9 = arith.mulf %8, %3 : vector<1x256xf32>
    %10 = arith.addf %7, %9 : vector<1x256xf32>
    %cst_7 = arith.constant 1.140000e-01 : f32
    %11 = vector.broadcast %cst_7 : f32 to vector<1x256xf32>
    %12 = arith.mulf %11, %5 : vector<1x256xf32>
    %13 = arith.addf %10, %12 : vector<1x256xf32>
    %c0_8 = arith.constant 0 : index
    %c0_9 = arith.constant 0 : index
    %14 = vector.load %arg3[%c0_8, %c0_9] : memref<1x256xf32, #tpu.memory_space<vmem>>, vector<1x256xf32>
    tpu.vector_store %arg3[%c0_8, %c0_9], %13 {strides = array<i32>} : memref<1x256xf32, #tpu.memory_space<vmem>>, vector<1x256xf32>,
    return
  }
  func.func @transform_0(%arg0: i32, %arg1: i32) -> (i32, i32, i32) {
    %c0_i32 = arith.constant 0 : i32
    %c0_i32_0 = arith.constant 0 : i32
    return %c0_i32, %arg0, %arg1 : i32, i32, i32
  }
  func.func @transform_1(%arg0: i32, %arg1: i32) -> (i32, i32) {
    %c0_i32 = arith.constant 0 : i32
    return %arg0, %arg1 : i32, i32
  }
}

</mosaic_0001>

<bundles_post_ra>
// kernel: tpu_custom_call.1
= control target key start
LH: loop header
LB: loop body
LE: loop exit
PB: predicated region body
PF: predicated region fallthrough
CT: control target
= control target key end

     0   :  { %6 = vsyncpa [#allocation3], 0  ;;  %s133_s0 = inlined_call_operand.hbm [shape: f32[3,1,256], index: 0, kind: input, shape index: {}]   ;;  %s134_s1 = inlined_call_operand.hbm [shape: f32[1,256], index: 1, kind: output, shape index: {}]  }
   0x1   :  { %7 = vsyncpa [#allocation4], 0  ;;  %s12_s8 = sshll.u32 %s133_s0, 4  ;;  %s113_s9 = smov [#allocation2]   ;;  %s13_s8 = int_to_ptr.hbm [resolvable:$true] %s12_s8 }
   0x2   :  { %s14_s10 = sshll.u32 %s113_s9, 4  ;;  %s114_s11 = smov 32   ;;  %s15_s10 = int_to_ptr.vmem [resolvable:$true] %s14_s10 }
   0x3   :  { %s115_s12 = smov 2  }
   0x4   :  { %20 = dma.hbm_to_vmem [thread:$0]  %s13_s8, 96, %s15_s10, [#allocation3], %s114_s11, %s114_s11, %s115_s12  }
   0x5   :  { %109 = dma.done.wait [#allocation3], 96  }
   0x6   :  { %110 = vsyncadd [#allocation3], 4294967200  ;;  %v25_v0 = vld [vmem:[#allocation2] sm:$0x3]  ;;  %v27_v1 = vld [vmem:[#allocation2 + $0x2] sm:$0x3]  ;;  %v35_v3 = vlaneseq }
   0x7   :  { %v29_v2 = vld [vmem:[#allocation2 + $0x4] sm:$0x3]  ;;  %v30_v4 = vmul.f32 0.2989, %v25_v0  ;;  %v31_v5 = vmul.f32 0.587, %v27_v1 }
   0x8   :  { %v33_v6 = vmul.f32 0.114, %v29_v2  ;;  %s116_s13 = smov [#allocation5]   ;;  %s47_s16 = sshll.u32 %s134_s1, 4  ;;  %vm37_vm0 = vcmp.lt.s32.totalorder %v35_v3, 256  ;;  %s48_s16 = int_to_ptr.hbm [resolvable:$true] %s47_s16 }
   0x9   :  { %s45_s14 = sshll.u32 %s116_s13, 4  ;;  %v32_v7 = vadd.f32 %v31_v5, %v30_v4  ;;  %s46_s14 = int_to_ptr.vmem [resolvable:$true] %s45_s14 }
   0xb   :  { %v34_v8 = vadd.f32 %v33_v6, %v32_v7 }
   0xd   :  { %39 = vst.msk [vmem:[#allocation5] sm:$0x3] %vm37_vm0, %v34_v8 }
   0xe   :  { %50 = dma.vmem_to_hbm [thread:$0]  %s46_s14, 32, %s48_s16, [#allocation4]  }
   0xf   :  { %111 = dma.done.wait [#allocation4], 32  }
  0x10   :  { %112 = vsyncadd [#allocation4], 4294967264 }
  0x11   :  { %55 = vsyncpa [#allocation3], 1 }
  0x12   :  { %56 = vsyncpa [#allocation4], 1 }

</bundles_post_ra>
